<compile_context>
chip_gen: v5e
topology: v5e:2x2
jax: 0.10.0
libtpu: 0.0.40
codegen_flags: <defaults>
</compile_context>

<pallas_src>
import functools
import math

import jax
import jax.numpy as jnp
from jax.experimental import pallas as pl
from jax.experimental.pallas import tpu as pltpu


INVALID_ACTION_PENALTY = -1e10
_NEG_BIG = -1e30      # bias on padded imitator lanes so they never win the row-max
LANE = 128


def _bcq_fused_kernel(
    x_ref, w1_ref, b1_ref, w2_ref, b2_ref, w3_ref, b3_ref, out_ref,
    *, log_drop_threshold, action_pad,
):
    x = x_ref[...]

    # Fused Q-net + imitator: layer-1 concatenated, layers 2/3 block-diagonal.
    h1 = jnp.dot(x, w1_ref[...], preferred_element_type=jnp.float32) + b1_ref[...]
    h1 = jnp.maximum(h1, 0.0)
    h2 = jnp.dot(h1, w2_ref[...], preferred_element_type=jnp.float32) + b2_ref[...]
    h2 = jnp.maximum(h2, 0.0)
    h3 = jnp.dot(h2, w3_ref[...], preferred_element_type=jnp.float32) + b3_ref[...]

    # Split at a lane-tile boundary (action_pad is a multiple of 128).
    q = h3[:, :action_pad]            # [TB, AP]  (q_values in cols [:A])
    logits = h3[:, action_pad:]       # [TB, AP]  (imitator logits in cols [:A])

    # probs/probs.max() < thr  <=>  logits < rowmax(logits) + log(thr)
    m = jnp.max(logits, axis=1, keepdims=True)
    invalid = (logits < m + log_drop_threshold).astype(jnp.float32)

    out_ref[...] = q + INVALID_ACTION_PENALTY * invalid


def pack_bcq_params(q_params, i_params):
    """Fuse the two MLPs' parameters.  Weights are [in, out], biases [1, out].

    Returns ((w1p, b1p, w2p, b2p, w3p, b3p), action_pad).
    Layer 3 is padded so each network's head occupies a full 128-lane slab.
    Padded imitator bias lanes are set to -1e30 so they never affect rowmax.
    """
    qw1, qb1, qw2, qb2, qw3, qb3 = q_params
    iw1, ib1, iw2, ib2, iw3, ib3 = i_params
    H1 = qw1.shape[1]
    H2, A = qw3.shape
    AP = ((A + LANE - 1) // LANE) * LANE

    f32 = jnp.float32
    # Layer 1: concatenate along the output dim.
    w1p = jnp.concatenate([qw1, iw1], axis=1)                       # [S, 2*H1]
    b1p = jnp.concatenate([qb1, ib1], axis=1)                       # [1, 2*H1]

    # Layer 2: block-diagonal.
    w2p = jnp.concatenate(
        [
            jnp.concatenate([qw2, jnp.zeros((H1, iw2.shape[1]), f32)], axis=1),
            jnp.concatenate([jnp.zeros((H1, qw2.shape[1]), f32), iw2], axis=1),
        ],
        axis=0,
    )                                                               # [2*H1, 2*H2]
    b2p = jnp.concatenate([qb2, ib2], axis=1)                       # [1, 2*H2]

    # Layer 3: block-diagonal with each head padded to AP lanes.
    qw3p = jnp.zeros((H2, AP), f32).at[:, :A].set(qw3)
    iw3p = jnp.zeros((H2, AP), f32).at[:, :A].set(iw3)
    w3p = jnp.concatenate(
        [
            jnp.concatenate([qw3p, jnp.zeros((H2, AP), f32)], axis=1),
            jnp.concatenate([jnp.zeros((H2, AP), f32), iw3p], axis=1),
        ],
        axis=0,
    )                                                               # [2*H2, 2*AP]
    qb3p = jnp.zeros((1, AP), f32).at[:, :A].set(qb3)
    ib3p = jnp.full((1, AP), _NEG_BIG, f32).at[:, :A].set(ib3)
    b3p = jnp.concatenate([qb3p, ib3p], axis=1)                     # [1, 2*AP]

    return (w1p, b1p, w2p, b2p, w3p, b3p), AP


def bcq_forward(x, packed_params, action_pad, action_dim, *, drop_threshold,
                batch_tile=None):
    """x: [B, state_dim] float32.  Returns constrained q-values [B, action_dim]."""
    B, S = x.shape
    w1p, b1p, w2p, b2p, w3p, b3p = packed_params

    if batch_tile is None:
        # Small batches: one grid step.  Large batches: big lane/sublane-dense tiles.
        batch_tile = B if B <= 1024 else 1024
    assert B % batch_tile == 0, "batch must be a multiple of the batch tile"
    grid = B // batch_tile

    def full_spec(arr):
        # whole-array block, same block at every grid step
        return pl.BlockSpec(arr.shape, lambda b: (0,) * arr.ndim)

    kernel = functools.partial(
        _bcq_fused_kernel,
        log_drop_threshold=float(math.log(drop_threshold)),
        action_pad=action_pad,
    )

    out_padded = pl.pallas_call(
        kernel,
        out_shape=jax.ShapeDtypeStruct((B, action_pad), jnp.float32),
        grid_spec=pltpu.PrefetchScalarGridSpec(
            num_scalar_prefetch=0,
            grid=(grid,),
            in_specs=[pl.BlockSpec((batch_tile, S), lambda b: (b, 0))]
            + [full_spec(a) for a in (w1p, b1p, w2p, b2p, w3p, b3p)],
            out_specs=pl.BlockSpec((batch_tile, action_pad), lambda b: (b, 0)),
        ),
        compiler_params=pltpu.CompilerParams(
            dimension_semantics=(("parallel",) if grid > 1 else ("arbitrary",)),
        ),
    )(x, w1p, b1p, w2p, b2p, w3p, b3p)

    return out_padded[:, :action_dim]


def _init_mlp(key, dims):
    """Deterministic init.  Weights [in, out], biases [1, out]."""
    params = []
    for d_in, d_out in zip(dims[:-1], dims[1:]):
        key, wk, bk = jax.random.split(key, 3)
        scale = 1.0 / jnp.sqrt(jnp.float32(d_in))
        w = jax.random.uniform(wk, (d_in, d_out), jnp.float32, -scale, scale)
        b = jax.random.uniform(bk, (1, d_out), jnp.float32, -scale, scale)
        params += [w, b]
    return tuple(params), key


def _reference(x, q_params, i_params, drop_threshold):
    def mlp(p):
        w1, b1, w2, b2, w3, b3 = p
        h1 = jnp.maximum(x @ w1 + b1, 0.0)
        h2 = jnp.maximum(h1 @ w2 + b2, 0.0)
        return h2 @ w3 + b3

    q = mlp(q_params)
    probs = jax.nn.softmax(mlp(i_params), axis=1)
    filt = probs / jnp.max(probs, axis=1, keepdims=True)
    invalid = (filt < drop_threshold).astype(jnp.float32)
    return q + INVALID_ACTION_PENALTY * invalid


if __name__ == "__main__":
    # Shapes mirror reagent/test/models/test_bcq.py: state_dim=10, action_dim=3,
    # hidden sizes [8, 4], bcq_drop_threshold=0.05.
    B, STATE_DIM, ACTION_DIM = 16, 10, 3
    HIDDEN = [8, 4]
    DROP_THRESHOLD = 0.05

    key = jax.random.PRNGKey(0)
    key, xk = jax.random.split(key)
    x = jax.random.normal(xk, (B, STATE_DIM), jnp.float32)

    q_params, key = _init_mlp(key, [STATE_DIM] + HIDDEN + [ACTION_DIM])
    i_params, key = _init_mlp(key, [STATE_DIM] + HIDDEN + [ACTION_DIM])

    packed, action_pad = pack_bcq_params(q_params, i_params)
    packed = jax.tree_util.tree_map(jax.block_until_ready, packed)

    out = bcq_forward(x, packed, action_pad, ACTION_DIM,
                      drop_threshold=DROP_THRESHOLD)
    out = jax.block_until_ready(out)

    ref = _reference(x, q_params, i_params, DROP_THRESHOLD)
    assert out.shape == (B, ACTION_DIM)
    assert jnp.allclose(out, ref, rtol=1e-4, atol=1e-2), "mismatch vs pure-JAX ref"

    print("KERNEL_OK")
</pallas_src>

<mosaic_0001>
module attributes {stable_mosaic.version = 11 : i64} {
  func.func @_bcq_fused_kernel(%arg0: i32, %arg1: memref<16x10xf32, #tpu.memory_space<vmem>>, %arg2: memref<10x16xf32, #tpu.memory_space<vmem>>, %arg3: memref<1x16xf32, #tpu.memory_space<vmem>>, %arg4: memref<16x8xf32, #tpu.memory_space<vmem>>, %arg5: memref<1x8xf32, #tpu.memory_space<vmem>>, %arg6: memref<8x256xf32, #tpu.memory_space<vmem>>, %arg7: memref<1x256xf32, #tpu.memory_space<vmem>>, %arg8: memref<16x128xf32, #tpu.memory_space<vmem>>) attributes {dimension_semantics = [#tpu.dimension_semantics<arbitrary>], iteration_bounds = array<i64: 1>, scalar_prefetch = 0 : i64, scratch_operands = 0 : i64, tpu.core_type = #tpu.core_type<tc>, window_params = [{transform_indices = @transform_0, window_bounds = array<i64: 16, 10>}, {pipeline_mode = #tpu.pipeline_mode<synchronous>, transform_indices = @transform_1, window_bounds = array<i64: 10, 16>}, {pipeline_mode = #tpu.pipeline_mode<synchronous>, transform_indices = @transform_2, window_bounds = array<i64: 1, 16>}, {pipeline_mode = #tpu.pipeline_mode<synchronous>, transform_indices = @transform_3, window_bounds = array<i64: 16, 8>}, {pipeline_mode = #tpu.pipeline_mode<synchronous>, transform_indices = @transform_4, window_bounds = array<i64: 1, 8>}, {pipeline_mode = #tpu.pipeline_mode<synchronous>, transform_indices = @transform_5, window_bounds = array<i64: 8, 256>}, {pipeline_mode = #tpu.pipeline_mode<synchronous>, transform_indices = @transform_6, window_bounds = array<i64: 1, 256>}, {transform_indices = @transform_7, window_bounds = array<i64: 16, 128>}]} {
    %c0 = arith.constant 0 : index
    %c0_0 = arith.constant 0 : index
    %0 = vector.load %arg1[%c0, %c0_0] : memref<16x10xf32, #tpu.memory_space<vmem>>, vector<16x10xf32>
    %c0_1 = arith.constant 0 : index
    %c0_2 = arith.constant 0 : index
    %1 = vector.load %arg2[%c0_1, %c0_2] : memref<10x16xf32, #tpu.memory_space<vmem>>, vector<10x16xf32>
    %cst = arith.constant dense<0.000000e+00> : vector<16x16xf32>
    %2 = tpu.matmul %0, %1, %cst {dimension_numbers = #tpu.dot_dimension_numbers<[1], [0], [0], [1], [0, 0, 1, 1], [], []>} : vector<16x10xf32>, vector<10x16xf32>, vector<16x16xf32> -> vector<16x16xf32>
    %c0_3 = arith.constant 0 : index
    %c0_4 = arith.constant 0 : index
    %3 = vector.load %arg3[%c0_3, %c0_4] : memref<1x16xf32, #tpu.memory_space<vmem>>, vector<1x16xf32>
    %4 = vector.broadcast %3 : vector<1x16xf32> to vector<16x16xf32>
    %5 = arith.addf %2, %4 : vector<16x16xf32>
    %cst_5 = arith.constant 0.000000e+00 : f32
    %6 = vector.broadcast %cst_5 : f32 to vector<16x16xf32>
    %7 = arith.maximumf %5, %6 : vector<16x16xf32>
    %c0_6 = arith.constant 0 : index
    %c0_7 = arith.constant 0 : index
    %8 = vector.load %arg4[%c0_6, %c0_7] : memref<16x8xf32, #tpu.memory_space<vmem>>, vector<16x8xf32>
    %cst_8 = arith.constant dense<0.000000e+00> : vector<16x8xf32>
    %9 = tpu.matmul %7, %8, %cst_8 {dimension_numbers = #tpu.dot_dimension_numbers<[1], [0], [0], [1], [0, 0, 1, 1], [], []>} : vector<16x16xf32>, vector<16x8xf32>, vector<16x8xf32> -> vector<16x8xf32>
    %c0_9 = arith.constant 0 : index
    %c0_10 = arith.constant 0 : index
    %10 = vector.load %arg5[%c0_9, %c0_10] : memref<1x8xf32, #tpu.memory_space<vmem>>, vector<1x8xf32>
    %11 = vector.broadcast %10 : vector<1x8xf32> to vector<16x8xf32>
    %12 = arith.addf %9, %11 : vector<16x8xf32>
    %cst_11 = arith.constant 0.000000e+00 : f32
    %13 = vector.broadcast %cst_11 : f32 to vector<16x8xf32>
    %14 = arith.maximumf %12, %13 : vector<16x8xf32>
    %c0_12 = arith.constant 0 : index
    %c0_13 = arith.constant 0 : index
    %15 = vector.load %arg6[%c0_12, %c0_13] : memref<8x256xf32, #tpu.memory_space<vmem>>, vector<8x256xf32>
    %cst_14 = arith.constant dense<0.000000e+00> : vector<16x256xf32>
    %16 = tpu.matmul %14, %15, %cst_14 {dimension_numbers = #tpu.dot_dimension_numbers<[1], [0], [0], [1], [0, 0, 1, 1], [], []>} : vector<16x8xf32>, vector<8x256xf32>, vector<16x256xf32> -> vector<16x256xf32>
    %c0_15 = arith.constant 0 : index
    %c0_16 = arith.constant 0 : index
    %17 = vector.load %arg7[%c0_15, %c0_16] : memref<1x256xf32, #tpu.memory_space<vmem>>, vector<1x256xf32>
    %18 = vector.broadcast %17 : vector<1x256xf32> to vector<16x256xf32>
    %19 = arith.addf %16, %18 : vector<16x256xf32>
    %20 = vector.extract_strided_slice %19 {offsets = [0, 0], sizes = [16, 128], strides = [1, 1]} : vector<16x256xf32> to vector<16x128xf32>
    %21 = vector.extract_strided_slice %19 {offsets = [0, 128], sizes = [16, 128], strides = [1, 1]} : vector<16x256xf32> to vector<16x128xf32>
    %cst_17 = arith.constant dense<0xFF800000> : vector<16xf32>
    %22 = vector.multi_reduction <maximumf>, %21, %cst_17 [1] : vector<16x128xf32> to vector<16xf32>
    %23 = vector.shape_cast %22 : vector<16xf32> to vector<16x1xf32>
    %cst_18 = arith.constant -2.99573231 : f32
    %24 = vector.broadcast %cst_18 : f32 to vector<16x1xf32>
    %25 = arith.addf %23, %24 : vector<16x1xf32>
    %26 = vector.broadcast %25 : vector<16x1xf32> to vector<16x128xf32>
    %27 = arith.cmpf olt, %21, %26 : vector<16x128xf32>
    %28 = arith.extui %27 : vector<16x128xi1> to vector<16x128xi32>
    %29 = arith.sitofp %28 : vector<16x128xi32> to vector<16x128xf32>
    %cst_19 = arith.constant -1.000000e+10 : f32
    %30 = vector.broadcast %cst_19 : f32 to vector<16x128xf32>
    %31 = arith.mulf %30, %29 : vector<16x128xf32>
    %32 = arith.addf %20, %31 : vector<16x128xf32>
    %c0_20 = arith.constant 0 : index
    %c0_21 = arith.constant 0 : index
    %33 = vector.load %arg8[%c0_20, %c0_21] : memref<16x128xf32, #tpu.memory_space<vmem>>, vector<16x128xf32>
    tpu.vector_store %arg8[%c0_20, %c0_21], %32 {strides = array<i32>} : memref<16x128xf32, #tpu.memory_space<vmem>>, vector<16x128xf32>,
    return
  }
  func.func @transform_0(%arg0: i32) -> (i32, i32) {
    %c0_i32 = arith.constant 0 : i32
    %c0_i32_0 = arith.constant 0 : i32
    return %arg0, %c0_i32 : i32, i32
  }
  func.func @transform_1(%arg0: i32) -> (i32, i32) {
    %c0_i32 = arith.constant 0 : i32
    %c0_i32_0 = arith.constant 0 : i32
    %c0_i32_1 = arith.constant 0 : i32
    return %c0_i32, %c0_i32_0 : i32, i32
  }
  func.func @transform_2(%arg0: i32) -> (i32, i32) {
    %c0_i32 = arith.constant 0 : i32
    %c0_i32_0 = arith.constant 0 : i32
    %c0_i32_1 = arith.constant 0 : i32
    return %c0_i32, %c0_i32_0 : i32, i32
  }
  func.func @transform_3(%arg0: i32) -> (i32, i32) {
    %c0_i32 = arith.constant 0 : i32
    %c0_i32_0 = arith.constant 0 : i32
    %c0_i32_1 = arith.constant 0 : i32
    return %c0_i32, %c0_i32_0 : i32, i32
  }
  func.func @transform_4(%arg0: i32) -> (i32, i32) {
    %c0_i32 = arith.constant 0 : i32
    %c0_i32_0 = arith.constant 0 : i32
    %c0_i32_1 = arith.constant 0 : i32
    return %c0_i32, %c0_i32_0 : i32, i32
  }
  func.func @transform_5(%arg0: i32) -> (i32, i32) {
    %c0_i32 = arith.constant 0 : i32
    %c0_i32_0 = arith.constant 0 : i32
    %c0_i32_1 = arith.constant 0 : i32
    return %c0_i32, %c0_i32_0 : i32, i32
  }
  func.func @transform_6(%arg0: i32) -> (i32, i32) {
    %c0_i32 = arith.constant 0 : i32
    %c0_i32_0 = arith.constant 0 : i32
    %c0_i32_1 = arith.constant 0 : i32
    return %c0_i32, %c0_i32_0 : i32, i32
  }
  func.func @transform_7(%arg0: i32) -> (i32, i32) {
    %c0_i32 = arith.constant 0 : i32
    %c0_i32_0 = arith.constant 0 : i32
    return %arg0, %c0_i32 : i32, i32
  }
}

</mosaic_0001>

<bundles_post_ra>
// kernel: tpu_custom_call.1
= control target key start
LH: loop header
LB: loop body
LE: loop exit
PB: predicated region body
PF: predicated region fallthrough
CT: control target
= control target key end

     0   :  { %12 = vsyncpa [#allocation3], 0  ;;  %s417_s0 = inlined_call_operand.vmem [shape: f32[16,10], index: 0, kind: input, shape index: {}]   ;;  %s418_s1 = inlined_call_operand.hbm [shape: f32[10,16], index: 1, kind: input, shape index: {}]   ;;  %s419_s2 = inlined_call_operand.vmem [shape: f32[1,16], index: 2, kind: input, shape index: {}]   ;;  %s420_s3 = inlined_call_operand.vmem [shape: f32[16,8], index: 3, kind: input, shape index: {}]   ;;  %s421_s4 = inlined_call_operand.vmem [shape: f32[1,8], index: 4, kind: input, shape index: {}]   ;;  %s422_s5 = inlined_call_operand.hbm [shape: f32[8,256], index: 5, kind: input, shape index: {}]   ;;  %s423_s6 = inlined_call_operand.vmem [shape: f32[1,256], index: 6, kind: input, shape index: {}]   ;;  %s424_s7 = inlined_call_operand.hbm [shape: f32[16,128], index: 7, kind: output, shape index: {}]  }
   0x1   :  { %13 = vsyncpa [#allocation6], 0 }
   0x2   :  { %14 = vsyncpa [#allocation4], 0  ;;  %s21_s26 = sshll.u32 %s418_s1, 4  ;;  %s335_s27 = smov [#allocation2]   ;;  %s22_s26 = int_to_ptr.hbm [resolvable:$true] %s21_s26 }
   0x3   :  { %s23_s28 = sshll.u32 %s335_s27, 4  ;;  %s41_s8 = sshll.u32 %s422_s5, 4  ;;  %s24_s28 = int_to_ptr.vmem [resolvable:$true] %s23_s28  ;;  %s42_s8 = int_to_ptr.hbm [resolvable:$true] %s41_s8 }
   0x4   :  { %s336_s9 = smov 128   ;;  %s337_s10 = smov 8  }
   0x5   :  { %29 = dma.hbm_to_vmem [thread:$0]  %s22_s26, 256, %s24_s28, [#allocation3], %s336_s9, %s336_s9, %s337_s10  }
   0x6   :  { %s338_s11 = smov [#allocation5]  }
   0x7   :  { %s43_s12 = sshll.u32 %s338_s11, 4  ;;  %s44_s12 = int_to_ptr.vmem [resolvable:$true] %s43_s12 }
   0x8   :  { %46 = dma.hbm_to_vmem [thread:$0]  %s42_s8, 256, %s44_s12, [#allocation6]  }
   0x9   :  { %329 = dma.done.wait [#allocation3], 256  }
   0xa   :  { %330 = vsyncadd [#allocation3], 4294967040 }
   0xb   :  { %331 = dma.done.wait [#allocation6], 256  }
   0xc   :  { %332 = vsyncadd [#allocation6], 4294967040  ;;  %vm72_vm0 = vcmask 1041408   ;;  %v60_v0 = vld [vmem:[#allocation2 + $0x8] sm:$0x3]  ;;  %v59_v1 = vld [vmem:[#allocation2] sm:$0xff] }
   0xd   :  { %238 = vmatpush.msk.msra.mxu0 %vm72_vm0, %v60_v0  ;;  %v57_v2 = vld [vmem:[%s417_s0] sm:$0xff]  ;;  %vm65_vm1 = vcmask 80896   ;;  %v58_v3 = vld [vmem:[%s417_s0 + $0x8] sm:$0xff]  ;;  %vm107_vm2 = vcmask 130048   ;;  %v139_v13 = vld [vmem:[#allocation5] sm:$0xff]  ;;  %vm147_vm3 = vcmask 64512  }
   0xe   :  { %v102_v4 = vld [vmem:[%s420_s3 + $0x8] sm:$0xff]  ;;  %v101_v5 = vld [vmem:[%s420_s3] sm:$0xff]  ;;  %v140_v14 = vld [vmem:[#allocation5 + $0x8] sm:$0xff]  ;;  %169 = vmatpush.msra.mxu2 %v139_v13  ;;  %v339_v32 = vmov 0.0   ;;  %s224_s24 = sshll.u32 %s424_s7, 4  ;;  %s225_s24 = int_to_ptr.hbm [resolvable:$true] %s224_s24 }
   0xf   :  { %91 = vmatpush.msra.mxu0 %v59_v1  ;;  %128 = vmatpush.msra.mxu1 %v102_v4  ;;  %v255_v6 = vld [vmem:[%s419_s2] ss:$0 sm:$0xff] }
  0x10   :  { %239 = vmatmul.msk.f32.vlgmr.msra.gmra.mxu0 %vm65_vm1, %v57_v2  ;;  %192 = vmatpush.msra.mxu3 %v140_v14  ;;  %v256_v15 = vld [vmem:[%s421_s4] ss:$0 sm:$0xff]  ;;  %s340_s4 = smov [#allocation7]  }
  0x11   :  { %129 = vmatpush.msra.mxu1 %v101_v5  ;;  %v141_v22 = vld [vmem:[%s423_s6] sm:$0x3]  ;;  %s222_s6 = sshll.u32 %s340_s4, 4  ;;  %s223_s6 = int_to_ptr.vmem [resolvable:$true] %s222_s6 }
  0x12   :  { %v144_v23 = vperm.slane %v141_v22, 1  ;;  %v143_v30 = vperm.slane %v141_v22, 0 }
  0x18   :  { %240 = vmatmul.msk.f32.gmra.mxu0 %vm65_vm1, %v58_v3 }
  0x8d   :  { %v93_v7 = vpop.f32.mrf.mxu0 }
  0x8e   :  { %v94_v8 = vadd.f32 %v255_v6, %v93_v7 }
  0x90   :  { %v99_v9 = vmax.f32 %v94_v8, 0.0 }
  0x92   :  { %241 = vmatmul.msk.f32.vlgmr.msra.gmra.mxu1 %vm107_vm2, %v99_v9 }
  0x95   :  { %v96_v10 = vpop.f32.mrf.mxu0 }
  0x96   :  { %v97_v11 = vadd.f32 %v255_v6, %v96_v10 }
  0x98   :  { %v100_v12 = vmax.f32 %v97_v11, 0.0 }
  0x9a   :  { %242 = vmatmul.msk.f32.gmra.mxu1 %vm107_vm2, %v100_v12 }
 0x10f   :  { %v131_v16 = vpop.f32.mrf.mxu1 }
 0x110   :  { %v132_v17 = vadd.f32 %v256_v15, %v131_v16 }
 0x112   :  { %v137_v18 = vmax.f32 %v132_v17, 0.0 }
 0x114   :  { %243 = vmatmul.msk.f32.vlgmr.msra.gmra.mxu2 %vm147_vm3, %v137_v18  ;;  %245 = vmatmul.msk.f32.vlgmr.msra.gmra.mxu3 %vm147_vm3, %v137_v18 }
 0x117   :  { %v134_v19 = vpop.f32.mrf.mxu1 }
 0x118   :  { %v135_v20 = vadd.f32 %v256_v15, %v134_v19 }
 0x11a   :  { %v138_v21 = vmax.f32 %v135_v20, 0.0 }
 0x11c   :  { %244 = vmatmul.msk.f32.gmra.mxu2 %vm147_vm3, %v138_v21  ;;  %246 = vmatmul.msk.f32.gmra.mxu3 %vm147_vm3, %v138_v21 }
 0x197   :  { %v194_v24 = vpop.f32.mrf.mxu3  ;;  %v171_v28 = vpop.f32.mrf.mxu2 }
 0x198   :  { %v195_v25 = vadd.f32 %v194_v24, %v144_v23  ;;  %v172_v34 = vadd.f32 %v171_v28, %v143_v30 }
 0x19a   :  { %200 = vmax.xlane.f32.xlu0 %v195_v25 }
 0x19f   :  { %v197_v26 = vpop.f32.mrf.mxu3  ;;  %v174_v39 = vpop.f32.mrf.mxu2 }
 0x1a0   :  { %v198_v27 = vadd.f32 %v197_v26, %v144_v23  ;;  %v175_v41 = vadd.f32 %v174_v39, %v143_v30 }
 0x1a2   :  { %202 = vmax.xlane.f32.xlu0 %v198_v27 }
 0x20d   :  { %v201_v29 = vpop.xlane.xlu0 %200 }
 0x20e   :  { %v204_v31 = vadd.f32 -2.9957323, %v201_v29 }
 0x210   :  { %vm206_vm4 = vcmp.lt.f32.partialorder %v195_v25, %v204_v31 }
 0x211   :  { %v247_v33 = vsel %vm206_vm4, 1.0, %v339_v32 }
 0x212   :  { %v212_v35 = vmul.f32 -1e+10, %v247_v33 }
 0x214   :  { %v214_v36 = vadd.f32 %v212_v35, %v172_v34 }
 0x215   :  { %v203_v37 = vpop.xlane.xlu0 %202 }
 0x216   :  { %216 = vst [vmem:[#allocation7] sm:$0xff] %v214_v36  ;;  %v205_v38 = vadd.f32 -2.9957323, %v203_v37 }
 0x218   :  { %vm207_vm5 = vcmp.lt.f32.partialorder %v198_v27, %v205_v38 }
 0x219   :  { %v248_v40 = vsel %vm207_vm5, 1.0, %v339_v32 }
 0x21a   :  { %v213_v42 = vmul.f32 -1e+10, %v248_v40 }
 0x21c   :  { %v215_v43 = vadd.f32 %v213_v42, %v175_v41 }
 0x21e   :  { %217 = vst [vmem:[#allocation7 + $0x8] sm:$0xff] %v215_v43 }
 0x21f   :  { %230 = dma.vmem_to_hbm [thread:$0]  %s223_s6, 256, %s225_s24, [#allocation4], %s336_s9, %s336_s9, %s337_s10  }
 0x220   :  { %333 = dma.done.wait [#allocation4], 256  }
 0x221   :  { %334 = vsyncadd [#allocation4], 4294967040 }
 0x222   :  { %235 = vsyncpa [#allocation3], 1 }
 0x223   :  { %236 = vsyncpa [#allocation6], 1 }
 0x224   :  { %237 = vsyncpa [#allocation4], 1 }

</bundles_post_ra>
